<compile_context>
chip_gen: v7x
topology: tpu7x:2x2x1
jax: 0.10.0
libtpu: 0.0.40
codegen_flags: <defaults>
</compile_context>

<pallas_src>
import functools

import jax
import jax.numpy as jnp
from jax.experimental import pallas as pl
from jax.experimental.pallas import tpu as pltpu


# ----------------------------- helpers -----------------------------------------


def _round_up(x, m):
    return (x + m - 1) // m * m


def _pad_to(a, shape):
    pads = [(0, s - d) for d, s in zip(a.shape, shape)]
    if all(p == (0, 0) for p in pads):
        return a
    return jnp.pad(a, pads)


def _default_block_batch(batch):
    b = _round_up(batch, 8)
    if b <= 256:
        return b  # small problem: a single big tile is fine
    # >= 2 grid steps (v7x megacore sharding), at most 512 rows per tile.
    return min(512, _round_up((b + 1) // 2, 8))


# ----------------------------- kernel -------------------------------------------


def _make_mlp_softmax_kernel(num_linears, num_classes):
    """Fused kernel: num_linears x (matmul + bias + ReLU) followed by row softmax."""

    def kernel(*refs):
        x_ref = refs[0]
        o_ref = refs[-1]
        p = refs[1:-1]  # (w1, b1, w2, b2, ..., wN, bN)  (pre-padded, pre-cast)

        h = x_ref[...]  # bf16 activations, lane-dense
        for i in range(num_linears):
            w = p[2 * i][...]       # (in_p, out_p) bf16, resident across grid steps
            b = p[2 * i + 1][...]   # (1, out_p) f32
            z = jnp.dot(h, w, preferred_element_type=jnp.float32) + b
            z = jnp.maximum(z, 0.0)  # F.relu applied after every layer
            if i + 1 < num_linears:
                h = z.astype(w.dtype)  # feed next MXU pass in bf16
            else:
                # Mask padded output lanes, then softmax over the real classes.
                lane = jax.lax.broadcasted_iota(jnp.int32, z.shape, 1)
                logits = jnp.where(lane < num_classes, z, -1e30)
                m = jnp.max(logits, axis=-1, keepdims=True)
                e = jnp.exp(logits - m)
                s = jnp.sum(e, axis=-1, keepdims=True)
                o_ref[...] = (e / s).astype(o_ref.dtype)

    return kernel


# ----------------------------- params -------------------------------------------


def init_classification_params(key, input_dim, output_dim, embbeding_dim, hidden_out,
                               hidden_dim=128, n_layers=2):
    """Embedding table + MLP Linear params (W stored as (in_features, out_features))."""
    k_emb, key = jax.random.split(key)
    table = jax.random.normal(k_emb, (embbeding_dim, hidden_out), jnp.float32)

    dims = [input_dim * hidden_out] + [hidden_dim] * n_layers + [output_dim]
    mlp = []
    for i in range(len(dims) - 1):
        key, kw, kb = jax.random.split(key, 3)
        bound = 1.0 / (dims[i] ** 0.5)
        w = jax.random.uniform(kw, (dims[i], dims[i + 1]), jnp.float32, -bound, bound)
        b = jax.random.uniform(kb, (dims[i + 1],), jnp.float32, -bound, bound)
        mlp.append((w, b))
    return table, mlp


def prepare_mlp_params(mlp_params, compute_dtype=jnp.bfloat16):
    """Pad every dim to a multiple of 128 and pre-cast weights to the compute dtype.

    Zero padding is exact: padded hidden units stay at relu(0) = 0 and contribute
    nothing downstream; padded output lanes are masked before the softmax.
    """
    prepped = []
    for w, b in mlp_params:
        fin, fout = w.shape
        fin_p, fout_p = _round_up(fin, 128), _round_up(fout, 128)
        prepped.append(_pad_to(w, (fin_p, fout_p)).astype(compute_dtype))
        prepped.append(_pad_to(b.reshape(1, -1), (1, fout_p)).astype(jnp.float32))
    return tuple(prepped)


# ----------------------------- forward ------------------------------------------


@functools.partial(jax.jit, static_argnames=("num_classes", "block_batch"))
def classification_forward(x_idx, table, mlp_prepped, *, num_classes, block_batch=None):
    """ClassificationModel forward.

    x_idx: (batch, input_dim) int32 token ids.  table: (vocab, hidden_out) f32.
    mlp_prepped: flat tuple from prepare_mlp_params.  Returns (batch, num_classes) probs.
    """
    batch = x_idx.shape[0]

    # Embedding lookup + flatten (XLA gather; see TODO at top of file).
    emb = jnp.take(table, x_idx, axis=0)                      # (B, I, E)
    feats = emb.reshape(batch, -1).astype(mlp_prepped[0].dtype)  # (B, I*E) bf16

    feat_pad = mlp_prepped[0].shape[0]
    out_pad = mlp_prepped[-1].shape[-1]
    num_linears = len(mlp_prepped) // 2

    if block_batch is None:
        block_batch = _default_block_batch(batch)
    batch_pad = _round_up(batch, block_batch)
    feats = _pad_to(feats, (batch_pad, feat_pad))

    grid = (batch_pad // block_batch,)
    x_spec = pl.BlockSpec((block_batch, feat_pad), lambda i: (i, 0))
    param_specs = [pl.BlockSpec(p.shape, lambda i: (0, 0)) for p in mlp_prepped]
    out_spec = pl.BlockSpec((block_batch, out_pad), lambda i: (i, 0))

    probs = pl.pallas_call(
        _make_mlp_softmax_kernel(num_linears, num_classes),
        out_shape=jax.ShapeDtypeStruct((batch_pad, out_pad), jnp.float32),
        grid_spec=pltpu.PrefetchScalarGridSpec(
            num_scalar_prefetch=0,
            grid=grid,
            in_specs=[x_spec] + param_specs,
            out_specs=out_spec,
        ),
        compiler_params=pltpu.CompilerParams(
            dimension_semantics=("parallel",),
            vmem_limit_bytes=48 * 1024 * 1024,  # headroom under v7x's 64 MiB VMEM
        ),
    )(feats, *mlp_prepped)

    return probs[:batch, :num_classes]


# ----------------------------- reference ----------------------------------------


def classification_reference(x_idx, table, mlp_params, compute_dtype=jnp.bfloat16):
    """Pure-JAX reference with identical math (bf16 operands, f32 accumulation)."""
    emb = jnp.take(table, x_idx, axis=0)
    h = emb.reshape(x_idx.shape[0], -1)
    for w, b in mlp_params:
        z = jnp.dot(h.astype(compute_dtype), w.astype(compute_dtype),
                    preferred_element_type=jnp.float32) + b[None, :]
        h = jnp.maximum(z, 0.0)  # relu after every layer
    return jax.nn.softmax(h, axis=-1)


# ----------------------------- main ----------------------------------------------


if __name__ == "__main__":
    key = jax.random.PRNGKey(0)
    k_x, k_p = jax.random.split(key)

    # Small shapes consistent with the module (hidden_dim=128, n_layers=2).
    batch, input_dim, output_dim = 16, 8, 10
    embbeding_dim, hidden_out = 32, 16  # vocab size, embedding width
    hidden_dim, n_layers = 128, 2

    x_idx = jax.random.randint(k_x, (batch, input_dim), 0, embbeding_dim, dtype=jnp.int32)
    table, mlp_params = init_classification_params(
        k_p, input_dim, output_dim, embbeding_dim, hidden_out, hidden_dim, n_layers)
    mlp_prepped = prepare_mlp_params(mlp_params, jnp.bfloat16)

    probs = classification_forward(x_idx, table, mlp_prepped, num_classes=output_dim)
    probs = jax.block_until_ready(probs)

    ref = classification_reference(x_idx, table, mlp_params, jnp.bfloat16)
    assert probs.shape == (batch, output_dim), probs.shape
    assert jnp.allclose(jnp.sum(probs, axis=-1), 1.0, atol=1e-3), "rows must sum to 1"
    assert jnp.allclose(probs, ref, atol=2e-3, rtol=2e-3), "mismatch vs reference"

    print("KERNEL_OK")
</pallas_src>

<mosaic_0001>
module attributes {stable_mosaic.version = 11 : i64} {
  func.func @kernel(%arg0: i32, %arg1: memref<16x128xbf16, #tpu.memory_space<vmem>>, %arg2: memref<128x128xbf16, #tpu.memory_space<vmem>>, %arg3: memref<1x128xf32, #tpu.memory_space<vmem>>, %arg4: memref<128x128xbf16, #tpu.memory_space<vmem>>, %arg5: memref<1x128xf32, #tpu.memory_space<vmem>>, %arg6: memref<128x128xbf16, #tpu.memory_space<vmem>>, %arg7: memref<1x128xf32, #tpu.memory_space<vmem>>, %arg8: memref<16x128xf32, #tpu.memory_space<vmem>>) attributes {dimension_semantics = [#tpu.dimension_semantics<parallel>], iteration_bounds = array<i64: 1>, scalar_prefetch = 0 : i64, scratch_operands = 0 : i64, tpu.core_type = #tpu.core_type<tc>, window_params = [{transform_indices = @transform_0, window_bounds = array<i64: 16, 128>}, {pipeline_mode = #tpu.pipeline_mode<synchronous>, transform_indices = @transform_1, window_bounds = array<i64: 128, 128>}, {pipeline_mode = #tpu.pipeline_mode<synchronous>, transform_indices = @transform_2, window_bounds = array<i64: 1, 128>}, {pipeline_mode = #tpu.pipeline_mode<synchronous>, transform_indices = @transform_3, window_bounds = array<i64: 128, 128>}, {pipeline_mode = #tpu.pipeline_mode<synchronous>, transform_indices = @transform_4, window_bounds = array<i64: 1, 128>}, {pipeline_mode = #tpu.pipeline_mode<synchronous>, transform_indices = @transform_5, window_bounds = array<i64: 128, 128>}, {pipeline_mode = #tpu.pipeline_mode<synchronous>, transform_indices = @transform_6, window_bounds = array<i64: 1, 128>}, {transform_indices = @transform_7, window_bounds = array<i64: 16, 128>}]} {
    %c0 = arith.constant 0 : index
    %c0_0 = arith.constant 0 : index
    %0 = vector.load %arg1[%c0, %c0_0] : memref<16x128xbf16, #tpu.memory_space<vmem>>, vector<16x128xbf16>
    %c0_1 = arith.constant 0 : index
    %c0_2 = arith.constant 0 : index
    %1 = vector.load %arg2[%c0_1, %c0_2] : memref<128x128xbf16, #tpu.memory_space<vmem>>, vector<128x128xbf16>
    %c0_3 = arith.constant 0 : index
    %c0_4 = arith.constant 0 : index
    %2 = vector.load %arg3[%c0_3, %c0_4] : memref<1x128xf32, #tpu.memory_space<vmem>>, vector<1x128xf32>
    %cst = arith.constant dense<0.000000e+00> : vector<16x128xf32>
    %3 = tpu.matmul %0, %1, %cst {dimension_numbers = #tpu.dot_dimension_numbers<[1], [0], [0], [1], [0, 0, 1, 1], [], []>} : vector<16x128xbf16>, vector<128x128xbf16>, vector<16x128xf32> -> vector<16x128xf32>
    %4 = vector.broadcast %2 : vector<1x128xf32> to vector<16x128xf32>
    %5 = arith.addf %3, %4 : vector<16x128xf32>
    %cst_5 = arith.constant 0.000000e+00 : f32
    %6 = vector.broadcast %cst_5 : f32 to vector<16x128xf32>
    %7 = arith.maximumf %5, %6 : vector<16x128xf32>
    %8 = arith.truncf %7 : vector<16x128xf32> to vector<16x128xbf16>
    %c0_6 = arith.constant 0 : index
    %c0_7 = arith.constant 0 : index
    %9 = vector.load %arg4[%c0_6, %c0_7] : memref<128x128xbf16, #tpu.memory_space<vmem>>, vector<128x128xbf16>
    %c0_8 = arith.constant 0 : index
    %c0_9 = arith.constant 0 : index
    %10 = vector.load %arg5[%c0_8, %c0_9] : memref<1x128xf32, #tpu.memory_space<vmem>>, vector<1x128xf32>
    %cst_10 = arith.constant dense<0.000000e+00> : vector<16x128xf32>
    %11 = tpu.matmul %8, %9, %cst_10 {dimension_numbers = #tpu.dot_dimension_numbers<[1], [0], [0], [1], [0, 0, 1, 1], [], []>} : vector<16x128xbf16>, vector<128x128xbf16>, vector<16x128xf32> -> vector<16x128xf32>
    %12 = vector.broadcast %10 : vector<1x128xf32> to vector<16x128xf32>
    %13 = arith.addf %11, %12 : vector<16x128xf32>
    %cst_11 = arith.constant 0.000000e+00 : f32
    %14 = vector.broadcast %cst_11 : f32 to vector<16x128xf32>
    %15 = arith.maximumf %13, %14 : vector<16x128xf32>
    %16 = arith.truncf %15 : vector<16x128xf32> to vector<16x128xbf16>
    %c0_12 = arith.constant 0 : index
    %c0_13 = arith.constant 0 : index
    %17 = vector.load %arg6[%c0_12, %c0_13] : memref<128x128xbf16, #tpu.memory_space<vmem>>, vector<128x128xbf16>
    %c0_14 = arith.constant 0 : index
    %c0_15 = arith.constant 0 : index
    %18 = vector.load %arg7[%c0_14, %c0_15] : memref<1x128xf32, #tpu.memory_space<vmem>>, vector<1x128xf32>
    %cst_16 = arith.constant dense<0.000000e+00> : vector<16x128xf32>
    %19 = tpu.matmul %16, %17, %cst_16 {dimension_numbers = #tpu.dot_dimension_numbers<[1], [0], [0], [1], [0, 0, 1, 1], [], []>} : vector<16x128xbf16>, vector<128x128xbf16>, vector<16x128xf32> -> vector<16x128xf32>
    %20 = vector.broadcast %18 : vector<1x128xf32> to vector<16x128xf32>
    %21 = arith.addf %19, %20 : vector<16x128xf32>
    %cst_17 = arith.constant 0.000000e+00 : f32
    %22 = vector.broadcast %cst_17 : f32 to vector<16x128xf32>
    %23 = arith.maximumf %21, %22 : vector<16x128xf32>
    %24 = tpu.iota {dimensions = array<i32: 1>} : vector<16x128xi32>
    %c10_i32 = arith.constant 10 : i32
    %25 = vector.broadcast %c10_i32 : i32 to vector<16x128xi32>
    %26 = arith.cmpi slt, %24, %25 : vector<16x128xi32>
    %cst_18 = arith.constant -1.000000e+30 : f32
    %27 = vector.broadcast %cst_18 : f32 to vector<16x128xf32>
    %28 = arith.select %26, %23, %27 : vector<16x128xi1>, vector<16x128xf32>
    %cst_19 = arith.constant dense<0xFF800000> : vector<16xf32>
    %29 = vector.multi_reduction <maximumf>, %28, %cst_19 [1] : vector<16x128xf32> to vector<16xf32>
    %30 = vector.shape_cast %29 : vector<16xf32> to vector<16x1xf32>
    %31 = vector.broadcast %30 : vector<16x1xf32> to vector<16x128xf32>
    %32 = arith.subf %28, %31 : vector<16x128xf32>
    %33 = math.exp %32 : vector<16x128xf32>
    %cst_20 = arith.constant dense<0.000000e+00> : vector<16xf32>
    %34 = vector.multi_reduction <add>, %33, %cst_20 [1] : vector<16x128xf32> to vector<16xf32>
    %35 = vector.shape_cast %34 : vector<16xf32> to vector<16x1xf32>
    %36 = vector.broadcast %35 : vector<16x1xf32> to vector<16x128xf32>
    %37 = arith.divf %33, %36 : vector<16x128xf32>
    %c0_21 = arith.constant 0 : index
    %c0_22 = arith.constant 0 : index
    %38 = vector.load %arg8[%c0_21, %c0_22] : memref<16x128xf32, #tpu.memory_space<vmem>>, vector<16x128xf32>
    tpu.vector_store %arg8[%c0_21, %c0_22], %37 {strides = array<i32>} : memref<16x128xf32, #tpu.memory_space<vmem>>, vector<16x128xf32>,
    return
  }
  func.func @transform_0(%arg0: i32) -> (i32, i32) {
    %c0_i32 = arith.constant 0 : i32
    %c0_i32_0 = arith.constant 0 : i32
    return %arg0, %c0_i32 : i32, i32
  }
  func.func @transform_1(%arg0: i32) -> (i32, i32) {
    %c0_i32 = arith.constant 0 : i32
    %c0_i32_0 = arith.constant 0 : i32
    %c0_i32_1 = arith.constant 0 : i32
    return %c0_i32, %c0_i32_0 : i32, i32
  }
  func.func @transform_2(%arg0: i32) -> (i32, i32) {
    %c0_i32 = arith.constant 0 : i32
    %c0_i32_0 = arith.constant 0 : i32
    %c0_i32_1 = arith.constant 0 : i32
    return %c0_i32, %c0_i32_0 : i32, i32
  }
  func.func @transform_3(%arg0: i32) -> (i32, i32) {
    %c0_i32 = arith.constant 0 : i32
    %c0_i32_0 = arith.constant 0 : i32
    %c0_i32_1 = arith.constant 0 : i32
    return %c0_i32, %c0_i32_0 : i32, i32
  }
  func.func @transform_4(%arg0: i32) -> (i32, i32) {
    %c0_i32 = arith.constant 0 : i32
    %c0_i32_0 = arith.constant 0 : i32
    %c0_i32_1 = arith.constant 0 : i32
    return %c0_i32, %c0_i32_0 : i32, i32
  }
  func.func @transform_5(%arg0: i32) -> (i32, i32) {
    %c0_i32 = arith.constant 0 : i32
    %c0_i32_0 = arith.constant 0 : i32
    %c0_i32_1 = arith.constant 0 : i32
    return %c0_i32, %c0_i32_0 : i32, i32
  }
  func.func @transform_6(%arg0: i32) -> (i32, i32) {
    %c0_i32 = arith.constant 0 : i32
    %c0_i32_0 = arith.constant 0 : i32
    %c0_i32_1 = arith.constant 0 : i32
    return %c0_i32, %c0_i32_0 : i32, i32
  }
  func.func @transform_7(%arg0: i32) -> (i32, i32) {
    %c0_i32 = arith.constant 0 : i32
    %c0_i32_0 = arith.constant 0 : i32
    return %arg0, %c0_i32 : i32, i32
  }
}

</mosaic_0001>

<bundles_post_ra>
// kernel: classification_forward.1
= control target key start
LH: loop header
LB: loop body
LE: loop exit
PB: predicated region body
PF: predicated region fallthrough
CT: control target
= control target key end

     0   :  { %v598_v1 = vmov 0.0   ;;  %vm599_vm0 = vmmov 0   ;;  %s769_s0 = inlined_call_operand.vmem [shape: bf16[16,128], index: 0, kind: input, shape index: {}]   ;;  %s770_s1 = inlined_call_operand.vmem [shape: bf16[128,128], index: 1, kind: input, shape index: {}]   ;;  %s771_s2 = inlined_call_operand.vmem [shape: f32[1,128], index: 2, kind: input, shape index: {}]   ;;  %s772_s3 = inlined_call_operand.vmem [shape: bf16[128,128], index: 3, kind: input, shape index: {}]   ;;  %s773_s4 = inlined_call_operand.vmem [shape: f32[1,128], index: 4, kind: input, shape index: {}]   ;;  %s774_s5 = inlined_call_operand.vmem [shape: bf16[128,128], index: 5, kind: input, shape index: {}]   ;;  %s775_s6 = inlined_call_operand.vmem [shape: f32[1,128], index: 6, kind: input, shape index: {}]   ;;  %s776_s7 = inlined_call_operand.hbm [shape: f32[16,128], index: 7, kind: output, shape index: {}]  }
   0x1   :  { %v541_v0 = vld [vmem:[%s770_s1] sm:$0xff]   ;;  %476 = vmatprep.subr.bf16.mxu0 %v598_v1  ;;  %496 = vmatprep.subr.bf16.mxu1 %v598_v1  ;;  %v542_v2 = vld [vmem:[%s770_s1 + $0x8] sm:$0xff]   ;;  %v543_v3 = vld [vmem:[%s770_s1 + $0x10] sm:$0xff]  }
   0x2   :  { %477 = vmatpush3.bf16.msra.mxu0 %v541_v0  ;;  %492 = vmatprep.mubr.msk.bf16.mxu0 %vm599_vm0, %v598_v1  ;;  %v550_v4 = vld [vmem:[%s772_s3] sm:$0xff]   ;;  %v544_v5 = vld [vmem:[%s770_s1 + $0x18] sm:$0xff]   ;;  %v551_v6 = vld [vmem:[%s772_s3 + $0x8] sm:$0xff]  }
   0x3   :  { %478 = vmatprep.subr.bf16.mxu0 %v598_v1  ;;  %512 = vmatprep.mubr.msk.bf16.mxu1 %vm599_vm0, %v598_v1  ;;  %v545_v7 = vld [vmem:[%s770_s1 + $0x20] sm:$0xff]   ;;  %v552_v8 = vld [vmem:[%s772_s3 + $0x10] sm:$0xff]   ;;  %v546_v9 = vld [vmem:[%s770_s1 + $0x28] sm:$0xff]  }
   0x4   :  { %497 = vmatpush3.bf16.msra.mxu1 %v550_v4  ;;  %v553_v10 = vld [vmem:[%s772_s3 + $0x18] sm:$0xff]   ;;  %v547_v11 = vld [vmem:[%s770_s1 + $0x30] sm:$0xff]  }
   0x5   :  { %498 = vmatprep.subr.bf16.mxu1 %v598_v1 }
   0x6   :  { %479 = vmatpush3.bf16.msra.mxu0 %v542_v2 }
   0x7   :  { %480 = vmatprep.subr.bf16.mxu0 %v598_v1 }
   0x8   :  { %499 = vmatpush3.bf16.msra.mxu1 %v551_v6 }
   0x9   :  { %500 = vmatprep.subr.bf16.mxu1 %v598_v1 }
   0xa   :  { %481 = vmatpush3.bf16.msra.mxu0 %v543_v3 }
   0xb   :  { %482 = vmatprep.subr.bf16.mxu0 %v598_v1 }
   0xc   :  { %501 = vmatpush3.bf16.msra.mxu1 %v552_v8 }
   0xd   :  { %502 = vmatprep.subr.bf16.mxu1 %v598_v1 }
   0xe   :  { %483 = vmatpush3.bf16.msra.mxu0 %v544_v5 }
   0xf   :  { %484 = vmatprep.subr.bf16.mxu0 %v598_v1 }
  0x12   :  { %485 = vmatpush3.bf16.msra.mxu0 %v545_v7 }
  0x13   :  { %486 = vmatprep.subr.bf16.mxu0 %v598_v1 }
  0x16   :  { %487 = vmatpush3.bf16.msra.mxu0 %v546_v9 }
  0x17   :  { %12 = vsyncpa [#allocation3], 0  ;;  %488 = vmatprep.subr.bf16.mxu0 %v598_v1  ;;  %503 = vmatpush3.bf16.msra.mxu1 %v553_v10  ;;  %v554_v12 = vld [vmem:[%s772_s3 + $0x20] sm:$0xff]   ;;  %v548_v13 = vld [vmem:[%s770_s1 + $0x38] sm:$0xff]   ;;  %v380_v46 = vlaneseq }
  0x18   :  { %504 = vmatprep.subr.bf16.mxu1 %v598_v1  ;;  %v555_v14 = vld [vmem:[%s772_s3 + $0x28] sm:$0xff]   ;;  %v549_v15 = vld [vmem:[%s769_s0] sm:$0xff]   ;;  %v556_v16 = vld [vmem:[%s772_s3 + $0x30] sm:$0xff]  }
  0x19   :  { %v557_v17 = vld [vmem:[%s772_s3 + $0x38] sm:$0xff]   ;;  %v558_v18 = vld [vmem:[%s774_s5] sm:$0xff]   ;;  %v559_v19 = vld [vmem:[%s774_s5 + $0x8] sm:$0xff]   ;;  %v381_v48 = vand.u32 127, %v380_v46 }
  0x1a   :  { %489 = vmatpush3.bf16.msra.mxu0 %v547_v11  ;;  %v560_v20 = vld [vmem:[%s774_s5 + $0x10] sm:$0xff]   ;;  %v561_v21 = vld [vmem:[%s774_s5 + $0x18] sm:$0xff]   ;;  %v562_v22 = vld [vmem:[%s774_s5 + $0x20] sm:$0xff]  }
  0x1b   :  { %490 = vmatprep.subr.bf16.mxu0 %v598_v1  ;;  %505 = vmatpush3.bf16.msra.mxu1 %v554_v12  ;;  %v563_v23 = vld [vmem:[%s774_s5 + $0x28] sm:$0xff]   ;;  %v421_v24 = vld [vmem:[%s771_s2] ss:$0 sm:$0xff]  ;;  %v564_v34 = vld [vmem:[%s774_s5 + $0x30] sm:$0xff]   ;;  %vm382_vm1 = vcmp.lt.s32.totalorder %v381_v48, 10 }
  0x1c   :  { %506 = vmatprep.subr.bf16.mxu1 %v598_v1  ;;  %v565_v35 = vld [vmem:[%s774_s5 + $0x38] sm:$0xff]   ;;  %v431_v36 = vld [vmem:[%s773_s4] ss:$0 sm:$0xff]  ;;  %s600_s4 = smov [#allocation2]  }
  0x1d   :  { %v440_v47 = vld [vmem:[%s775_s6] ss:$0 sm:$0xff]  ;;  %s410_s5 = sshll.u32 %s600_s4, 4  ;;  %s411_s5 = int_to_ptr.vmem [resolvable:$true] %s410_s5 }
  0x1e   :  { %491 = vmatpush3.bf16.msra.mxu0 %v548_v13  ;;  %s574_s6 = scalar_lea.vmem %s411_s5, 256  ;;  %p579_p1 = scmp.lt.s32.totalorder %s411_s5, %s411_s5 }
  0x1f   :  { %507 = vmatpush3.bf16.msra.mxu1 %v555_v14  ;;  %516 = vmatprep.subr.bf16.mxu0 %v598_v1  ;;  %p575_p0 = scmp.ne.s32.totalorder %s411_s5, %s574_s6  ;;  %p580_p2 = scmp.lt.s32.totalorder %s574_s6, %s574_s6 }
  0x20   :  { %508 = vmatprep.subr.bf16.mxu1 %v598_v1 }
  0x21   :  { %493 = vmatmul.mubr.bf16.vlgmr.msra.gmra.mrb[0].mxu0 %v549_v15  ;;  %p581_p3 = por %p580_p2, %p579_p1 }
  0x22   :  { %532 = vmatprep.mubr.msk.bf16.mxu0 %vm599_vm0, %v598_v1  ;;  %517 = vmatpush3.bf16.msra.mxu0 %v558_v18 }
  0x23   :  { %509 = vmatpush3.bf16.msra.mxu1 %v556_v16  ;;  %518 = vmatprep.subr.bf16.mxu0 %v598_v1  ;;  %p582_p4 = pnand %p581_p3, %p575_p0 }
  0x24   :  { %510 = vmatprep.subr.bf16.mxu1 %v598_v1 }
  0x26   :  { %519 = vmatpush3.bf16.msra.mxu0 %v559_v19 }
  0x27   :  { %511 = vmatpush3.bf16.msra.mxu1 %v557_v17  ;;  %520 = vmatprep.subr.bf16.mxu0 %v598_v1 }
  0x2a   :  { %521 = vmatpush3.bf16.msra.mxu0 %v560_v20 }
  0x2b   :  { %522 = vmatprep.subr.bf16.mxu0 %v598_v1 }
  0x2e   :  { %523 = vmatpush3.bf16.msra.mxu0 %v561_v21 }
  0x2f   :  { %524 = vmatprep.subr.bf16.mxu0 %v598_v1 }
  0x32   :  { %525 = vmatpush3.bf16.msra.mxu0 %v562_v22 }
  0x33   :  { %526 = vmatprep.subr.bf16.mxu0 %v598_v1 }
  0x36   :  { %527 = vmatpush3.bf16.msra.mxu0 %v563_v23 }
  0x37   :  { %528 = vmatprep.subr.bf16.mxu0 %v598_v1 }
  0x3a   :  { %529 = vmatpush3.bf16.msra.mxu0 %v564_v34 }
  0x3b   :  { %530 = vmatprep.subr.bf16.mxu0 %v598_v1 }
  0x3e   :  { %531 = vmatpush3.bf16.msra.mxu0 %v565_v35 }
  0xf4   :  { %v141_v25 = vpop.f32.mrb[0].mxu0 }
  0xf5   :  { %v142_v26 = vadd.f32 %v421_v24, %v141_v25  ;;  %v494_v27 = vpop.f32.mrb[1].mxu0 }
  0xf6   :  { %v144_v28 = vpop.f32.mrb[2].mxu0 }
  0xf7   :  { %v145_v29 = vadd.f32 %v421_v24, %v144_v28  ;;  %v495_v30 = vpop.f32.mrb[3].mxu0  ;;  %v148_v31 = vmax.f32 %v142_v26, 0.0 }
  0xf9   :  { %v149_v32 = vmax.f32 %v145_v29, 0.0 }
  0xfb   :  { %v150_v33 = vpack.c.bf16 %v149_v32, %v148_v31 }
  0xfd   :  { %513 = vmatmul.mubr.bf16.vlgmr.msra.gmra.mrb[0].mxu1 %v150_v33 }
 0x1d0   :  { %v256_v37 = vpop.f32.mrb[0].mxu1 }
 0x1d1   :  { %v257_v38 = vadd.f32 %v431_v36, %v256_v37  ;;  %v514_v39 = vpop.f32.mrb[1].mxu1 }
 0x1d2   :  { %v259_v40 = vpop.f32.mrb[2].mxu1 }
 0x1d3   :  { %v260_v41 = vadd.f32 %v431_v36, %v259_v40  ;;  %v515_v42 = vpop.f32.mrb[3].mxu1  ;;  %v263_v43 = vmax.f32 %v257_v38, 0.0 }
 0x1d5   :  { %v264_v44 = vmax.f32 %v260_v41, 0.0 }
 0x1d7   :  { %v265_v45 = vpack.c.bf16 %v264_v44, %v263_v43 }
 0x1d9   :  { %533 = vmatmul.mubr.bf16.vlgmr.msra.gmra.mrb[4].mxu0 %v265_v45 }
 0x2ac   :  { %v371_v49 = vpop.f32.mrb[4].mxu0 }
 0x2ad   :  { %v372_v50 = vadd.f32 %v440_v47, %v371_v49  ;;  %v534_v51 = vpop.f32.mrb[5].mxu0 }
 0x2ae   :  { %v374_v52 = vpop.f32.mrb[6].mxu0 }
 0x2af   :  { %v378_v53 = vmax.f32 %v372_v50, 0.0  ;;  %v375_v54 = vadd.f32 %v440_v47, %v374_v52  ;;  %v535_v55 = vpop.f32.mrb[7].mxu0 }
 0x2b1   :  { %v379_v56 = vmax.f32 %v375_v54, 0.0  ;;  %v383_v57 = vsel %vm382_vm1, %v378_v53, -1e+30 }
 0x2b2   :  { %385 = vmax.xlane.f32.xlu0 %v383_v57 }
 0x2b3   :  { %v384_v58 = vsel %vm382_vm1, %v379_v56, -1e+30 }
 0x2b6   :  { %387 = vmax.xlane.f32.xlu0 %v384_v58 }
 0x33f   :  { %v386_v59 = vpop.xlane.xlu0 %385 }
 0x340   :  { %v389_v60 = vsub.f32 %v383_v57, %v386_v59 }
 0x342   :  { %v391_v61 = vmul.f32 1.442695, %v389_v60 }
 0x343   :  { %v388_v62 = vpop.xlane.xlu0 %387 }
 0x344   :  { %566 = vpow2.f32 %v391_v61  ;;  %v390_v63 = vsub.f32 %v384_v58, %v388_v62 }
 0x346   :  { %v393_v0 = vmul.f32 1.442695, %v390_v63 }
 0x348   :  { %568 = vpow2.f32 %v393_v0 }
 0x34e   :  { %v567_v1 = vpop.eup %566 }
 0x34f   :  { %395 = vadd.xlane.f32.xlu1 %v567_v1 }
 0x352   :  { %v569_v2 = vpop.eup %568 }
 0x353   :  { %397 = vadd.xlane.f32.xlu1 %v569_v2 }
 0x3dc   :  { %v396_v3 = vpop.xlane.xlu1 %395 }
 0x3dd   :  { %570 = vrcp.f32 %v396_v3 }
 0x3e0   :  { %v398_v4 = vpop.xlane.xlu1 %397 }
 0x3e1   :  { %572 = vrcp.f32 %v398_v4 }
 0x3e7   :  { %v571_v5 = vpop.eup %570 }
 0x3e8   :  { %v400_v6 = vmul.f32 %v571_v5, %v567_v1 }
 0x3ea   :  { %403 = vst [vmem:[#allocation2] sm:$0xff] %v400_v6 }
 0x3eb   :  { %v573_v7 = vpop.eup %572 }
 0x3ec   :  { %v402_v8 = vmul.f32 %v573_v7, %v569_v2 }
 0x3ee   :  { %404 = vst [vmem:[#allocation2 + $0x8] sm:$0xff] %v402_v8 }
 0x3ef   :  { %585 = shalt.err (!%p582_p4)
}
 0x3f0   :  { %s586_s8 = scalar_lea.hbm %s776_s7, 256 }
 0x3f1   :  { %p587_p5 = scmp.ne.s32.totalorder %s776_s7, %s586_s8  ;;  %p590_p6 = scmp.lt.u32.totalorder %s586_s8, %s776_s7 }
 0x3f3   :  { %p592_p7 = pnand %p590_p6, %p587_p5 }
 0x3f5   :  { %595 = shalt.err (!%p592_p7)
}
 0x3f6   :  { %s601_s12 = smov 128   ;;  %s602_s13 = smov 8  }
 0x3f7   :  { %416 = dma.vmem_to_hbm [thread:$0]  %s411_s5, 256, %s776_s7, [#allocation3], %s601_s12, %s601_s12, %s602_s13  }
 0x3f8   :  { %596 = dma.done.wait [#allocation3], 256  }
 0x3f9   :  { %597 = vsyncadd [#allocation3], 4294967040 }
 0x3fa   :  { %420 = vsyncpa [#allocation3], 1 }

</bundles_post_ra>
